<compile_context>
chip_gen: v6e
topology: v6e:2x2x1
jax: 0.10.0
libtpu: 0.0.40
codegen_flags: <defaults>
</compile_context>

<pallas_src>
import numpy as np
import jax
import jax.numpy as jnp
from jax import lax
from jax.experimental import pallas as pl
from jax.experimental.pallas import tpu as pltpu

_EPS = 1e-5  # torch BatchNorm1d default eps


def _dense_feature_kernel(idx_ref, num_ref, rvocab_ref, rnum_ref, gsum_ref,
                          gnum_ref, bnum_ref, g1_ref, b1_ref, g2e_ref, b2e_ref,
                          first_ref, second_ref):
    B, n_emb = idx_ref.shape
    n_num = num_ref.shape[1]
    C = rvocab_ref.shape[0]
    F = n_emb + n_num

    # ---- numeric_feature_bn : BatchNorm1d(n_num), batch statistics (axis-0 reduce) ----
    x = num_ref[...]
    mu = jnp.mean(x, axis=0, keepdims=True)
    var = jnp.mean(jnp.square(x - mu), axis=0, keepdims=True)     # biased var (torch)
    xn = (x - mu) * lax.rsqrt(var + _EPS) * gnum_ref[...] + bnum_ref[...]

    # ---- combined one-hot over the concatenated vocabulary ----
    # Indices are pre-offset into disjoint ranges, so a single [B, C] one-hot with
    # n_emb ones per row drives one gather-as-matmul for all categorical columns.
    idx = idx_ref[...]
    cols = lax.broadcasted_iota(jnp.int32, (B, C), 1)
    oh = jnp.zeros((B, C), jnp.float32)
    for j in range(n_emb):                                         # tiny VPU compares
        oh = oh + (cols == idx[:, j:j + 1]).astype(jnp.float32)

    # ---- one fused MXU pass: embedding lookups + numeric weighting + dim-1 concat ----
    # fused[:, :F] = first-order features  [t1 lookups | xn * w1]
    # fused[:, F:] = second-order features [t2 lookups | xn (x) w2]   (lane-dense, f-major)
    fused = (jnp.dot(oh, rvocab_ref[...], preferred_element_type=jnp.float32)
             + jnp.dot(xn, rnum_ref[...], preferred_element_type=jnp.float32))
    fo = fused[:, :F]                                              # [B, F]
    so = fused[:, F:]                                              # [B, F*D]

    # ---- first_feature_bn : BatchNorm1d over [B, F] (axis-0 reduce, single store) ----
    m1 = jnp.mean(fo, axis=0, keepdims=True)
    v1 = jnp.mean(jnp.square(fo - m1), axis=0, keepdims=True)
    first_ref[...] = (fo - m1) * lax.rsqrt(v1 + _EPS) * g1_ref[...] + b1_ref[...]

    # ---- second_feature_bn : BatchNorm1d over [B, F, D], stats over (batch, D) ----
    # axis-0 reduce (VPU) + block-ones grouping matmul (gsum pre-scaled by 1/(B*D));
    # no cross-lane reduction, stats come out already broadcast over the D columns.
    col_sum = jnp.sum(so, axis=0, keepdims=True)                                # [1, F*D]
    m2 = jnp.dot(col_sum, gsum_ref[...], preferred_element_type=jnp.float32)    # [1, F*D]
    cent = so - m2
    col_sq = jnp.sum(jnp.square(cent), axis=0, keepdims=True)
    v2 = jnp.dot(col_sq, gsum_ref[...], preferred_element_type=jnp.float32)
    second_ref[...] = cent * lax.rsqrt(v2 + _EPS) * g2e_ref[...] + b2e_ref[...]


def _build_fused_tables(params, col_sizes, n_emb, n_num, emb_dim):
    """Block-expanded RHS tables so one matmul performs lookup + weighting + concat."""
    t1 = np.asarray(params["t1"], np.float32)        # [C, 1]
    t2 = np.asarray(params["t2"], np.float32)        # [C, D]
    w1 = np.asarray(params["w1_num"], np.float32)    # [1, n_num]
    w2 = np.asarray(params["w2_num"], np.float32)    # [n_num, D]
    C, D = t2.shape
    F = n_emb + n_num
    offsets = np.cumsum([0] + list(col_sizes))

    r_vocab = np.zeros((C, F + F * D), np.float32)
    for j in range(n_emb):
        lo, hi = int(offsets[j]), int(offsets[j + 1])
        r_vocab[lo:hi, j] = t1[lo:hi, 0]                                   # first-order col j
        r_vocab[lo:hi, F + j * D: F + (j + 1) * D] = t2[lo:hi, :]          # second-order block j

    r_num = np.zeros((n_num, F + F * D), np.float32)
    for i in range(n_num):
        r_num[i, n_emb + i] = w1[0, i]                                     # xn * w1
        r_num[i, F + (n_emb + i) * D: F + (n_emb + i + 1) * D] = w2[i, :]  # xn (x) w2
    return jnp.asarray(r_vocab), jnp.asarray(r_num)


def dense_feature_layer(cat_idx, numeric, params, *, emb_dim, col_sizes):
    B, n_emb = cat_idx.shape
    n_num = numeric.shape[1]
    F = n_emb + n_num
    D = emb_dim
    C = params["t2"].shape[0]

    r_vocab, r_num = _build_fused_tables(params, col_sizes, n_emb, n_num, D)
    # Grouping matmul for BN2: block-ones (D x D per feature), pre-scaled by 1/(B*D).
    g_sum = jnp.asarray(np.kron(np.eye(F, dtype=np.float32),
                                np.ones((D, D), np.float32)) / float(B * D))
    # gamma2/beta2 expanded to the lane-dense [1, F*D] layout (feature-major).
    g2e = jnp.repeat(params["gamma2"].reshape(F), D).reshape(1, F * D)
    b2e = jnp.repeat(params["beta2"].reshape(F), D).reshape(1, F * D)

    vmem = pl.BlockSpec(memory_space=pltpu.MemorySpace.VMEM)   # full-array block, single step
    wide = F + F * D
    flops = 2 * B * C * wide + 2 * B * n_num * wide + 4 * (F * D) * (F * D) + 10 * B * wide
    bytes_accessed = 4 * (B * n_emb + B * n_num + C * wide + n_num * wide + (F * D) ** 2
                          + 2 * n_num + 2 * F + 2 * F * D + B * F + B * F * D)

    first, second2d = pl.pallas_call(
        _dense_feature_kernel,
        out_shape=(jax.ShapeDtypeStruct((B, F), jnp.float32),
                   jax.ShapeDtypeStruct((B, F * D), jnp.float32)),
        in_specs=[vmem] * 11,
        out_specs=(vmem, vmem),
        compiler_params=pltpu.CompilerParams(vmem_limit_bytes=32 * 1024 * 1024),
        cost_estimate=pl.CostEstimate(flops=int(flops), transcendentals=int(n_num + F + F * D),
                                      bytes_accessed=int(bytes_accessed)),
    )(cat_idx, numeric, r_vocab, r_num, g_sum,
      params["gamma_num"], params["beta_num"],
      params["gamma1"], params["beta1"], g2e, b2e)

    # Lane-dense [B, F*D] -> module layout [B, F, D]; contiguous reshape, free at XLA level.
    return first, second2d.reshape(B, F, D)


def reference(cat_idx, numeric, params):
    """Plain-JAX mirror of the PyTorch forward (for verification)."""
    fo_cat = params["t1"][:, 0][cat_idx]                       # [B, n_emb]
    so_cat = params["t2"][cat_idx]                             # [B, n_emb, D]
    x = numeric
    mu = x.mean(0, keepdims=True)
    var = jnp.square(x - mu).mean(0, keepdims=True)
    xn = (x - mu) / jnp.sqrt(var + _EPS) * params["gamma_num"] + params["beta_num"]
    fo = jnp.concatenate([fo_cat, xn * params["w1_num"]], axis=1)
    so = jnp.concatenate([so_cat, xn[:, :, None] * params["w2_num"][None]], axis=1)
    m1 = fo.mean(0, keepdims=True)
    v1 = jnp.square(fo - m1).mean(0, keepdims=True)
    fo = (fo - m1) / jnp.sqrt(v1 + _EPS) * params["gamma1"] + params["beta1"]
    m2 = so.mean(axis=(0, 2), keepdims=True)
    v2 = jnp.square(so - m2).mean(axis=(0, 2), keepdims=True)
    so = (so - m2) / jnp.sqrt(v2 + _EPS) * params["gamma2"][None] + params["beta2"][None]
    return fo, so


if __name__ == "__main__":
    key = jax.random.PRNGKey(0)
    B, emb_dim = 8, 8
    emb_columns = ["cat_a", "cat_b", "cat_c"]
    numeric_columns = ["num_x", "num_y"]
    nrof_cat = {"cat_a": 5, "cat_b": 7, "cat_c": 11}
    n_emb, n_num = len(emb_columns), len(numeric_columns)
    F = n_emb + n_num
    C_total = sum(nrof_cat[c] for c in emb_columns)

    keys = jax.random.split(key, 8)
    # Embedding tables (torch nn.Embedding default init ~ N(0,1)), concatenated row-wise.
    t1 = jax.random.normal(keys[0], (C_total, 1), jnp.float32)            # first-order, dim 1
    t2 = jax.random.normal(keys[1], (C_total, emb_dim), jnp.float32)      # second-order, emb_dim
    # Numeric-column weights: xavier_uniform on (1,1) and (emb_dim,1) as in the module.
    lim1 = float(np.sqrt(6.0 / (1 + 1)))
    w1_num = jax.random.uniform(keys[2], (1, n_num), jnp.float32, -lim1, lim1)
    lim2 = float(np.sqrt(6.0 / (emb_dim + 1)))
    w2_num = jax.random.uniform(keys[3], (n_num, emb_dim), jnp.float32, -lim2, lim2)
    params = dict(
        t1=t1, t2=t2, w1_num=w1_num, w2_num=w2_num,
        gamma_num=jnp.ones((1, n_num), jnp.float32), beta_num=jnp.zeros((1, n_num), jnp.float32),
        gamma1=jnp.ones((1, F), jnp.float32), beta1=jnp.zeros((1, F), jnp.float32),
        gamma2=jnp.ones((F, 1), jnp.float32), beta2=jnp.zeros((F, 1), jnp.float32),
    )

    # Synthetic column dict (each column is a length-B vector, as the module's forward expects).
    input_data = {}
    for i, c in enumerate(emb_columns):
        input_data[c] = jax.random.randint(keys[4 + i], (B,), 0, nrof_cat[c], jnp.int32)
    input_data["num_x"] = jax.random.normal(keys[7], (B,), jnp.float32)
    input_data["num_y"] = jax.random.normal(jax.random.fold_in(keys[7], 1), (B,), jnp.float32)

    # Glue: stack columns; add static row offsets into the combined embedding tables.
    col_sizes = [nrof_cat[c] for c in emb_columns]
    offsets = np.cumsum([0] + col_sizes[:-1]).astype(np.int32)
    cat_idx = jnp.stack(
        [input_data[c] + int(offsets[i]) for i, c in enumerate(emb_columns)], axis=1
    ).astype(jnp.int32)
    numeric = jnp.stack([input_data[c] for c in numeric_columns], axis=1).astype(jnp.float32)

    first, second = dense_feature_layer(cat_idx, numeric, params,
                                        emb_dim=emb_dim, col_sizes=col_sizes)
    jax.block_until_ready((first, second))

    ref_f, ref_s = reference(cat_idx, numeric, params)
    np.testing.assert_allclose(np.asarray(first), np.asarray(ref_f), rtol=1e-4, atol=1e-4)
    np.testing.assert_allclose(np.asarray(second), np.asarray(ref_s), rtol=1e-4, atol=1e-4)
    print("KERNEL_OK")
</pallas_src>

<mosaic_0001>
module attributes {stable_mosaic.version = 11 : i64} {
  func.func @_dense_feature_kernel(%arg0: memref<8x3xi32, #tpu.memory_space<vmem>>, %arg1: memref<8x2xf32, #tpu.memory_space<vmem>>, %arg2: memref<23x45xf32, #tpu.memory_space<vmem>>, %arg3: memref<2x45xf32, #tpu.memory_space<vmem>>, %arg4: memref<40x40xf32, #tpu.memory_space<vmem>>, %arg5: memref<1x2xf32, #tpu.memory_space<vmem>>, %arg6: memref<1x2xf32, #tpu.memory_space<vmem>>, %arg7: memref<1x5xf32, #tpu.memory_space<vmem>>, %arg8: memref<1x5xf32, #tpu.memory_space<vmem>>, %arg9: memref<1x40xf32, #tpu.memory_space<vmem>>, %arg10: memref<1x40xf32, #tpu.memory_space<vmem>>, %arg11: memref<8x5xf32, #tpu.memory_space<vmem>>, %arg12: memref<8x40xf32, #tpu.memory_space<vmem>>) attributes {dimension_semantics = [], scalar_prefetch = 0 : i64, scratch_operands = 0 : i64, tpu.core_type = #tpu.core_type<tc>} {
    %c0 = arith.constant 0 : index
    %c0_0 = arith.constant 0 : index
    %0 = vector.load %arg1[%c0, %c0_0] : memref<8x2xf32, #tpu.memory_space<vmem>>, vector<8x2xf32>
    %cst = arith.constant dense<0.000000e+00> : vector<2xf32>
    %1 = vector.multi_reduction <add>, %0, %cst [0] : vector<8x2xf32> to vector<2xf32>
    %2 = vector.shape_cast %1 : vector<2xf32> to vector<1x2xf32>
    %cst_1 = arith.constant 8.000000e+00 : f32
    %3 = vector.broadcast %cst_1 : f32 to vector<1x2xf32>
    %4 = arith.divf %2, %3 : vector<1x2xf32>
    %5 = vector.broadcast %4 : vector<1x2xf32> to vector<8x2xf32>
    %6 = arith.subf %0, %5 : vector<8x2xf32>
    %7 = arith.mulf %6, %6 : vector<8x2xf32>
    %cst_2 = arith.constant dense<0.000000e+00> : vector<2xf32>
    %8 = vector.multi_reduction <add>, %7, %cst_2 [0] : vector<8x2xf32> to vector<2xf32>
    %9 = vector.shape_cast %8 : vector<2xf32> to vector<1x2xf32>
    %cst_3 = arith.constant 8.000000e+00 : f32
    %10 = vector.broadcast %cst_3 : f32 to vector<1x2xf32>
    %11 = arith.divf %9, %10 : vector<1x2xf32>
    %12 = vector.broadcast %4 : vector<1x2xf32> to vector<8x2xf32>
    %13 = arith.subf %0, %12 : vector<8x2xf32>
    %cst_4 = arith.constant 9.99999974E-6 : f32
    %14 = vector.broadcast %cst_4 : f32 to vector<1x2xf32>
    %15 = arith.addf %11, %14 : vector<1x2xf32>
    %16 = math.rsqrt %15 : vector<1x2xf32>
    %17 = vector.broadcast %16 : vector<1x2xf32> to vector<8x2xf32>
    %18 = arith.mulf %13, %17 : vector<8x2xf32>
    %c0_5 = arith.constant 0 : index
    %c0_6 = arith.constant 0 : index
    %19 = vector.load %arg5[%c0_5, %c0_6] : memref<1x2xf32, #tpu.memory_space<vmem>>, vector<1x2xf32>
    %20 = vector.broadcast %19 : vector<1x2xf32> to vector<8x2xf32>
    %21 = arith.mulf %18, %20 : vector<8x2xf32>
    %c0_7 = arith.constant 0 : index
    %c0_8 = arith.constant 0 : index
    %22 = vector.load %arg6[%c0_7, %c0_8] : memref<1x2xf32, #tpu.memory_space<vmem>>, vector<1x2xf32>
    %23 = vector.broadcast %22 : vector<1x2xf32> to vector<8x2xf32>
    %24 = arith.addf %21, %23 : vector<8x2xf32>
    %c0_9 = arith.constant 0 : index
    %c0_10 = arith.constant 0 : index
    %25 = vector.load %arg0[%c0_9, %c0_10] : memref<8x3xi32, #tpu.memory_space<vmem>>, vector<8x3xi32>
    %26 = tpu.iota {dimensions = array<i32: 1>} : vector<8x23xi32>
    %cst_11 = arith.constant 0.000000e+00 : f32
    %27 = vector.broadcast %cst_11 : f32 to vector<8x23xf32>
    %28 = vector.extract_strided_slice %25 {offsets = [0, 0], sizes = [8, 1], strides = [1, 1]} : vector<8x3xi32> to vector<8x1xi32>
    %29 = vector.broadcast %28 : vector<8x1xi32> to vector<8x23xi32>
    %30 = arith.cmpi eq, %26, %29 : vector<8x23xi32>
    %31 = arith.extui %30 : vector<8x23xi1> to vector<8x23xi32>
    %32 = arith.sitofp %31 : vector<8x23xi32> to vector<8x23xf32>
    %33 = arith.addf %27, %32 : vector<8x23xf32>
    %34 = vector.extract_strided_slice %25 {offsets = [0, 1], sizes = [8, 1], strides = [1, 1]} : vector<8x3xi32> to vector<8x1xi32>
    %35 = vector.broadcast %34 : vector<8x1xi32> to vector<8x23xi32>
    %36 = arith.cmpi eq, %26, %35 : vector<8x23xi32>
    %37 = arith.extui %36 : vector<8x23xi1> to vector<8x23xi32>
    %38 = arith.sitofp %37 : vector<8x23xi32> to vector<8x23xf32>
    %39 = arith.addf %33, %38 : vector<8x23xf32>
    %40 = vector.extract_strided_slice %25 {offsets = [0, 2], sizes = [8, 1], strides = [1, 1]} : vector<8x3xi32> to vector<8x1xi32>
    %41 = vector.broadcast %40 : vector<8x1xi32> to vector<8x23xi32>
    %42 = arith.cmpi eq, %26, %41 : vector<8x23xi32>
    %43 = arith.extui %42 : vector<8x23xi1> to vector<8x23xi32>
    %44 = arith.sitofp %43 : vector<8x23xi32> to vector<8x23xf32>
    %45 = arith.addf %39, %44 : vector<8x23xf32>
    %c0_12 = arith.constant 0 : index
    %c0_13 = arith.constant 0 : index
    %46 = vector.load %arg2[%c0_12, %c0_13] : memref<23x45xf32, #tpu.memory_space<vmem>>, vector<23x45xf32>
    %cst_14 = arith.constant dense<0.000000e+00> : vector<8x45xf32>
    %47 = tpu.matmul %45, %46, %cst_14 {dimension_numbers = #tpu.dot_dimension_numbers<[1], [0], [0], [1], [0, 0, 1, 1], [], []>} : vector<8x23xf32>, vector<23x45xf32>, vector<8x45xf32> -> vector<8x45xf32>
    %c0_15 = arith.constant 0 : index
    %c0_16 = arith.constant 0 : index
    %48 = vector.load %arg3[%c0_15, %c0_16] : memref<2x45xf32, #tpu.memory_space<vmem>>, vector<2x45xf32>
    %cst_17 = arith.constant dense<0.000000e+00> : vector<8x45xf32>
    %49 = tpu.matmul %24, %48, %cst_17 {dimension_numbers = #tpu.dot_dimension_numbers<[1], [0], [0], [1], [0, 0, 1, 1], [], []>} : vector<8x2xf32>, vector<2x45xf32>, vector<8x45xf32> -> vector<8x45xf32>
    %50 = arith.addf %47, %49 : vector<8x45xf32>
    %51 = vector.extract_strided_slice %50 {offsets = [0, 0], sizes = [8, 5], strides = [1, 1]} : vector<8x45xf32> to vector<8x5xf32>
    %52 = vector.extract_strided_slice %50 {offsets = [0, 5], sizes = [8, 40], strides = [1, 1]} : vector<8x45xf32> to vector<8x40xf32>
    %cst_18 = arith.constant dense<0.000000e+00> : vector<5xf32>
    %53 = vector.multi_reduction <add>, %51, %cst_18 [0] : vector<8x5xf32> to vector<5xf32>
    %54 = vector.shape_cast %53 : vector<5xf32> to vector<1x5xf32>
    %cst_19 = arith.constant 8.000000e+00 : f32
    %55 = vector.broadcast %cst_19 : f32 to vector<1x5xf32>
    %56 = arith.divf %54, %55 : vector<1x5xf32>
    %57 = vector.broadcast %56 : vector<1x5xf32> to vector<8x5xf32>
    %58 = arith.subf %51, %57 : vector<8x5xf32>
    %59 = arith.mulf %58, %58 : vector<8x5xf32>
    %cst_20 = arith.constant dense<0.000000e+00> : vector<5xf32>
    %60 = vector.multi_reduction <add>, %59, %cst_20 [0] : vector<8x5xf32> to vector<5xf32>
    %61 = vector.shape_cast %60 : vector<5xf32> to vector<1x5xf32>
    %cst_21 = arith.constant 8.000000e+00 : f32
    %62 = vector.broadcast %cst_21 : f32 to vector<1x5xf32>
    %63 = arith.divf %61, %62 : vector<1x5xf32>
    %64 = vector.broadcast %56 : vector<1x5xf32> to vector<8x5xf32>
    %65 = arith.subf %51, %64 : vector<8x5xf32>
    %cst_22 = arith.constant 9.99999974E-6 : f32
    %66 = vector.broadcast %cst_22 : f32 to vector<1x5xf32>
    %67 = arith.addf %63, %66 : vector<1x5xf32>
    %68 = math.rsqrt %67 : vector<1x5xf32>
    %69 = vector.broadcast %68 : vector<1x5xf32> to vector<8x5xf32>
    %70 = arith.mulf %65, %69 : vector<8x5xf32>
    %c0_23 = arith.constant 0 : index
    %c0_24 = arith.constant 0 : index
    %71 = vector.load %arg7[%c0_23, %c0_24] : memref<1x5xf32, #tpu.memory_space<vmem>>, vector<1x5xf32>
    %72 = vector.broadcast %71 : vector<1x5xf32> to vector<8x5xf32>
    %73 = arith.mulf %70, %72 : vector<8x5xf32>
    %c0_25 = arith.constant 0 : index
    %c0_26 = arith.constant 0 : index
    %74 = vector.load %arg8[%c0_25, %c0_26] : memref<1x5xf32, #tpu.memory_space<vmem>>, vector<1x5xf32>
    %75 = vector.broadcast %74 : vector<1x5xf32> to vector<8x5xf32>
    %76 = arith.addf %73, %75 : vector<8x5xf32>
    %c0_27 = arith.constant 0 : index
    %c0_28 = arith.constant 0 : index
    %77 = vector.load %arg11[%c0_27, %c0_28] : memref<8x5xf32, #tpu.memory_space<vmem>>, vector<8x5xf32>
    tpu.vector_store %arg11[%c0_27, %c0_28], %76 {strides = array<i32>} : memref<8x5xf32, #tpu.memory_space<vmem>>, vector<8x5xf32>,
    %cst_29 = arith.constant dense<0.000000e+00> : vector<40xf32>
    %78 = vector.multi_reduction <add>, %52, %cst_29 [0] : vector<8x40xf32> to vector<40xf32>
    %79 = vector.shape_cast %78 : vector<40xf32> to vector<1x40xf32>
    %c0_30 = arith.constant 0 : index
    %c0_31 = arith.constant 0 : index
    %80 = vector.load %arg4[%c0_30, %c0_31] : memref<40x40xf32, #tpu.memory_space<vmem>>, vector<40x40xf32>
    %cst_32 = arith.constant dense<0.000000e+00> : vector<1x40xf32>
    %81 = tpu.matmul %79, %80, %cst_32 {dimension_numbers = #tpu.dot_dimension_numbers<[1], [0], [0], [1], [0, 0, 1, 1], [], []>} : vector<1x40xf32>, vector<40x40xf32>, vector<1x40xf32> -> vector<1x40xf32>
    %82 = vector.broadcast %81 : vector<1x40xf32> to vector<8x40xf32>
    %83 = arith.subf %52, %82 : vector<8x40xf32>
    %84 = arith.mulf %83, %83 : vector<8x40xf32>
    %cst_33 = arith.constant dense<0.000000e+00> : vector<40xf32>
    %85 = vector.multi_reduction <add>, %84, %cst_33 [0] : vector<8x40xf32> to vector<40xf32>
    %86 = vector.shape_cast %85 : vector<40xf32> to vector<1x40xf32>
    %c0_34 = arith.constant 0 : index
    %c0_35 = arith.constant 0 : index
    %87 = vector.load %arg4[%c0_34, %c0_35] : memref<40x40xf32, #tpu.memory_space<vmem>>, vector<40x40xf32>
    %cst_36 = arith.constant dense<0.000000e+00> : vector<1x40xf32>
    %88 = tpu.matmul %86, %87, %cst_36 {dimension_numbers = #tpu.dot_dimension_numbers<[1], [0], [0], [1], [0, 0, 1, 1], [], []>} : vector<1x40xf32>, vector<40x40xf32>, vector<1x40xf32> -> vector<1x40xf32>
    %cst_37 = arith.constant 9.99999974E-6 : f32
    %89 = vector.broadcast %cst_37 : f32 to vector<1x40xf32>
    %90 = arith.addf %88, %89 : vector<1x40xf32>
    %91 = math.rsqrt %90 : vector<1x40xf32>
    %92 = vector.broadcast %91 : vector<1x40xf32> to vector<8x40xf32>
    %93 = arith.mulf %83, %92 : vector<8x40xf32>
    %c0_38 = arith.constant 0 : index
    %c0_39 = arith.constant 0 : index
    %94 = vector.load %arg9[%c0_38, %c0_39] : memref<1x40xf32, #tpu.memory_space<vmem>>, vector<1x40xf32>
    %95 = vector.broadcast %94 : vector<1x40xf32> to vector<8x40xf32>
    %96 = arith.mulf %93, %95 : vector<8x40xf32>
    %c0_40 = arith.constant 0 : index
    %c0_41 = arith.constant 0 : index
    %97 = vector.load %arg10[%c0_40, %c0_41] : memref<1x40xf32, #tpu.memory_space<vmem>>, vector<1x40xf32>
    %98 = vector.broadcast %97 : vector<1x40xf32> to vector<8x40xf32>
    %99 = arith.addf %96, %98 : vector<8x40xf32>
    %c0_42 = arith.constant 0 : index
    %c0_43 = arith.constant 0 : index
    %100 = vector.load %arg12[%c0_42, %c0_43] : memref<8x40xf32, #tpu.memory_space<vmem>>, vector<8x40xf32>
    tpu.vector_store %arg12[%c0_42, %c0_43], %99 {strides = array<i32>} : memref<8x40xf32, #tpu.memory_space<vmem>>, vector<8x40xf32>,
    return
  }
}

</mosaic_0001>

<bundles_post_ra>
// kernel: tpu_custom_call.1
= control target key start
LH: loop header
LB: loop body
LE: loop exit
PB: predicated region body
PF: predicated region fallthrough
CT: control target
= control target key end

     0   :  { %18 = vsyncpa [#allocation3], 0  ;;  %s887_s0 = inlined_call_operand.vmem [shape: s32[8,3], index: 0, kind: input, shape index: {}]   ;;  %s888_s1 = inlined_call_operand.vmem [shape: f32[8,2], index: 1, kind: input, shape index: {}]   ;;  %s889_s2 = inlined_call_operand.vmem [shape: f32[23,45], index: 2, kind: input, shape index: {}]   ;;  %s890_s3 = inlined_call_operand.vmem [shape: f32[2,45], index: 3, kind: input, shape index: {}]   ;;  %s891_s4 = inlined_call_operand.hbm [shape: f32[40,40], index: 4, kind: input, shape index: {}]   ;;  %s892_s5 = inlined_call_operand.vmem [shape: f32[1,2], index: 5, kind: input, shape index: {}]   ;;  %s893_s6 = inlined_call_operand.vmem [shape: f32[1,2], index: 6, kind: input, shape index: {}]   ;;  %s894_s7 = inlined_call_operand.vmem [shape: f32[1,5], index: 7, kind: input, shape index: {}]   ;;  %s895_s8 = inlined_call_operand.vmem [shape: f32[1,5], index: 8, kind: input, shape index: {}]   ;;  %s896_s9 = inlined_call_operand.vmem [shape: f32[1,40], index: 9, kind: input, shape index: {}]   ;;  %s897_s10 = inlined_call_operand.vmem [shape: f32[1,40], index: 10, kind: input, shape index: {}]   ;;  %s898_s11 = inlined_call_operand.hbm [shape: f32[8,5], index: 11, kind: output, shape index: {0}]   ;;  %s899_s12 = inlined_call_operand.hbm [shape: f32[8,40], index: 12, kind: output, shape index: {1}]  }
   0x1   :  { %19 = vsyncpa [#allocation4], 0 }
   0x2   :  { %20 = vsyncpa [#allocation7], 0  ;;  %s724_s21 = smov [#allocation2]  }
   0x3   :  { %s34_s22 = sshll.u32 %s724_s21, 4  ;;  %s35_s22 = int_to_ptr.vmem [resolvable:$true] %s34_s22 }
   0x4   :  { %s666_s23 = scalar_lea.vmem %s35_s22, 640  ;;  %p671_p1 = scmp.lt.s32.totalorder %s35_s22, %s35_s22 }
   0x5   :  { %p667_p0 = scmp.ne.s32.totalorder %s35_s22, %s666_s23  ;;  %p672_p2 = scmp.lt.s32.totalorder %s666_s23, %s666_s23 }
   0x7   :  { %p673_p3 = por %p672_p2, %p671_p1 }
   0x9   :  { %p674_p4 = pnand %p673_p3, %p667_p0 }
   0xb   :  { %677 = shalt.err (!%p674_p4)
}
   0xc   :  { %s725_s24 = smov 128   ;;  %s726_s25 = smov 8  }
   0xd   :  { %40 = dma.hbm_to_vmem [thread:$0]  %s891_s4, 640, %s35_s22, [#allocation3], %s725_s24, %s725_s24, %s726_s25  }
   0xe   :  { %718 = dma.done.wait [#allocation3], 640  }
   0xf   :  { %719 = vsyncadd [#allocation3], 4294966656  ;;  %v727_v0 = vmov 0   ;;  %v728_v1 = vmov 2   ;;  %v729_v2 = vmov 0.0   ;;  %vm57_vm0 = vcmask 15360  }
  0x10   :  { %648 = vset.pattern.permute.xlu0 %v727_v0  ;;  %650 = vset.pattern.permute.xlu1 %v728_v1  ;;  %v96_v3 = vld [vmem:[%s887_s0] sm:$0xff]  ;;  %v122_v6 = vld [vmem:[%s889_s2 + $0x10] sm:$0x7f]  ;;  %vm205_vm1 = vcmask 1046528   ;;  %vm127_vm2 = vcmask 1041408   ;;  %v121_v9 = vld [vmem:[%s889_s2 + $0x8] sm:$0xff]  ;;  %v97_v35 = vlaneseq }
  0x11   :  { %601 = vmatprep.subr.mxu1 %v729_v2  ;;  %596 = vmatprep.subr.mxu0 %v729_v2  ;;  %v56_v4 = vld [vmem:[%s888_s1] sm:$0xff]  ;;  %v730_v11 = vmov 1   ;;  %vm731_vm3 = vmmov 0   ;;  %vm201_vm7 = vcmask 187392   ;;  %v329_v46 = vld [vmem:[#allocation2 + $0x18] sm:$0xff]  ;;  %v328_v47 = vld [vmem:[#allocation2 + $0x10] sm:$0xff] }
  0x12   :  { %100 = vperm.xlu0 %648, %v96_v3   ;;  %114 = vperm.xlu1 %650, %v96_v3   ;;  %v58_v5 = vsel %vm57_vm0, %v56_v4, 0.0  ;;  %v123_v8 = vld [vmem:[%s890_s3] sm:$0x3]  ;;  %v98_v36 = vand.u32 127, %v97_v35  ;;  %v327_v48 = vld [vmem:[#allocation2 + $0x8] sm:$0xff]  ;;  %vm318_vm8 = vcmask 367656  }
  0x13   :  { %v59_v7 = vrot.slane %v58_v5, 4  ;;  %602 = vmatpush3.msk.msra.mxu1 %vm205_vm1, %v122_v6  ;;  %597 = vmatpush3.msk.msra.mxu0 %vm127_vm2, %v123_v8  ;;  %v120_v13 = vld [vmem:[%s889_s2] sm:$0xff]  ;;  %vm279_vm9 = vcmask 39936   ;;  %vm334_vm10 = vcmask 326656   ;;  %s734_s27 = smov [#allocation5]  }
  0x14   :  { %603 = vmatprep.subr.mxu1 %v729_v2  ;;  %598 = vmatprep.mubr.msk.f32.mxu0 %vm731_vm3, %v729_v2  ;;  %v563_v30 = vld [vmem:[%s892_s5] ss:$0 sm:$0xff]  ;;  %s732_s5 = smov 123   ;;  %s540_s28 = sshll.u32 %s734_s27, 4  ;;  %s541_s28 = int_to_ptr.vmem [resolvable:$true] %s540_s28 }
  0x15   :  { %v60_v10 = vadd.f32 %v59_v7, %v58_v5  ;;  %604 = vmatpush3.msra.mxu1 %v121_v9  ;;  %607 = vmatprep.mubr.msk.f32.mxu1 %vm731_vm3, %v729_v2  ;;  %v564_v32 = vld [vmem:[%s893_s6] ss:$0 sm:$0xff]  ;;  %s678_s29 = scalar_lea.vmem %s541_s28, 128  ;;  %p683_p6 = scmp.lt.s32.totalorder %s541_s28, %s541_s28 }
  0x16   :  { %649 = vset.pattern.permute.xlu0 %v730_v11  ;;  %605 = vmatprep.subr.mxu1 %v729_v2  ;;  %v330_v45 = vld [vmem:[#allocation2 + $0x20] sm:$0xff]  ;;  %p679_p5 = scmp.ne.s32.totalorder %s541_s28, %s678_s29  ;;  %p684_p7 = scmp.lt.s32.totalorder %s678_s29, %s678_s29 }
  0x17   :  { %107 = vperm.xlu0 %649, %v96_v3   ;;  %v61_v12 = vrot.slane %v60_v10, 2  ;;  %610 = vmatprep.subr.mxu0 %v729_v2  ;;  %v326_v49 = vld [vmem:[#allocation2] sm:$0xff] }
  0x18   :  { %606 = vmatpush3.msra.mxu1 %v120_v13  ;;  %p685_p8 = por %p684_p7, %p683_p6 }
  0x19   :  { %v62_v14 = vadd.f32 %v61_v12, %v60_v10  ;;  %623 = vmatprep.subr.mxu1 %v729_v2 }
  0x1a   :  { %p686_p9 = pnand %p685_p8, %p679_p5 }
  0x1b   :  { %v63_v15 = vrot.slane %v62_v14, 1  ;;  %651 = vset.pattern.permute.xlu0 %v728_v1 }
  0x1d   :  { %v64_v16 = vadd.f32 %v63_v15, %v62_v14 }
  0x1f   :  { %v66_v17 = vmul.f32 0.125, %v64_v16 }
  0x21   :  { %v67_v18 = vsub.f32 %v56_v4, %v66_v17 }
  0x23   :  { %v68_v19 = vmul.f32 %v67_v18, %v67_v18 }
  0x25   :  { %v69_v20 = vsel %vm57_vm0, %v68_v19, 0.0 }
  0x26   :  { %v70_v21 = vrot.slane %v69_v20, 4 }
  0x28   :  { %v71_v22 = vadd.f32 %v70_v21, %v69_v20  ;;  %v573_v20 = vld [vmem:[%s895_s8] ss:$0 sm:$0xff] }
  0x2a   :  { %v72_v23 = vrot.slane %v71_v22, 2 }
  0x2c   :  { %v73_v24 = vadd.f32 %v72_v23, %v71_v22 }
  0x2e   :  { %v74_v25 = vrot.slane %v73_v24, 1 }
  0x30   :  { %v75_v26 = vadd.f32 %v74_v25, %v73_v24  ;;  %v408_v24 = vshrl.u32 %v97_v35, 7 }
  0x32   :  { %v76_v27 = vmul.f32 0.125, %v75_v26  ;;  %v409_v25 = vsub.s32 0, %v408_v24 }
  0x34   :  { %v77_v28 = vadd.f32 1e-05, %v76_v27 }
  0x36   :  { %652 = vrsqrt.f32 %v77_v28 }
  0x43   :  { %v653_v29 = vpop.eup %652 }
  0x44   :  { %v79_v31 = vmul.f32 %v653_v29, %v67_v18  ;;  %v572_v18 = vld [vmem:[%s894_s7] ss:$0 sm:$0xff]  ;;  %s733_s7 = smov 5  }
  0x46   :  { %v87_v33 = vmul.f32 %v563_v30, %v79_v31 }
  0x48   :  { %v95_v34 = vadd.f32 %v564_v32, %v87_v33 }
  0x4a   :  { %599 = vmatmul.mubr.msk.f32.vlgmr.msra.gmra.mxu0 %vm57_vm0, %v95_v34 }
  0x4b   :  { %620 = vmatprep.mubr.msk.f32.mxu0 %vm731_vm3, %v729_v2  ;;  %611 = vmatpush3.msra.mxu0 %v330_v45 }
  0x4c   :  { %612 = vmatprep.subr.mxu0 %v729_v2 }
  0x4d   :  { %613 = vmatpush3.msra.mxu0 %v329_v46 }
  0x4e   :  { %614 = vmatprep.subr.mxu0 %v729_v2 }
  0x4f   :  { %615 = vmatpush3.msra.mxu0 %v328_v47 }
  0x50   :  { %616 = vmatprep.subr.mxu0 %v729_v2 }
  0x51   :  { %617 = vmatpush3.msra.mxu0 %v327_v48 }
  0x52   :  { %618 = vmatprep.subr.mxu0 %v729_v2 }
  0x53   :  { %619 = vmatpush3.msra.mxu0 %v326_v49 }
  0x8d   :  { %v101_v37 = vpop.permute.xlu0 %100  ;;  %v115_v38 = vpop.permute.xlu1 %114 }
  0x8e   :  { %vm102_vm4 = vcmp.eq.s32.totalorder %v98_v36, %v101_v37  ;;  %vm116_vm5 = vcmp.eq.s32.totalorder %v98_v36, %v115_v38 }
  0x8f   :  { %v565_v40 = vsel %vm102_vm4, 1.0, %v729_v2  ;;  %v567_v42 = vsel %vm116_vm5, 1.0, %v729_v2 }
  0x92   :  { %v108_v39 = vpop.permute.xlu0 %107 }
  0x93   :  { %vm109_vm6 = vcmp.eq.s32.totalorder %v98_v36, %v108_v39 }
  0x94   :  { %v566_v41 = vsel %vm109_vm6, 1.0, %v729_v2 }
  0x95   :  { %v112_v43 = vadd.f32 %v566_v41, %v565_v40  ;;  %v576_v40 = vld [vmem:[%s896_s9] ss:$0 sm:$0xff] }
  0x97   :  { %v119_v44 = vadd.f32 %v567_v42, %v112_v43 }
  0x99   :  { %608 = vmatmul.mubr.msk.f32.vlgmr.msra.gmra.mxu1 %vm201_vm7, %v119_v44 }
  0x9a   :  { %633 = vmatprep.mubr.msk.f32.mxu1 %vm731_vm3, %v729_v2  ;;  %624 = vmatpush3.msra.mxu1 %v330_v45 }
  0x9b   :  { %625 = vmatprep.subr.mxu1 %v729_v2 }
  0x9c   :  { %626 = vmatpush3.msra.mxu1 %v329_v46  ;;  %v577_v46 = vld [vmem:[%s897_s10] ss:$0 sm:$0xff] }
  0x9d   :  { %627 = vmatprep.subr.mxu1 %v729_v2 }
  0x9e   :  { %628 = vmatpush3.msra.mxu1 %v328_v47 }
  0x9f   :  { %629 = vmatprep.subr.mxu1 %v729_v2 }
  0xa0   :  { %630 = vmatpush3.msra.mxu1 %v327_v48 }
  0xa1   :  { %631 = vmatprep.subr.mxu1 %v729_v2 }
  0xa2   :  { %632 = vmatpush3.msra.mxu1 %v326_v49 }
 0x10a   :  { %v197_v50 = vpop.f32.mrf.mxu0 }
 0x10c   :  { %v600_v51 = vpop.f32.mrf.mxu0 }
 0x159   :  { %v275_v52 = vpop.f32.mrf.mxu1 }
 0x15a   :  { %v276_v53 = vadd.f32 %v275_v52, %v197_v50 }
 0x15b   :  { %v609_v54 = vpop.f32.mrf.mxu1 }
 0x15c   :  { %v319_v55 = vsel %vm318_vm8, %v276_v53, 0.0  ;;  %v280_v56 = vsel %vm279_vm9, %v276_v53, 0.0 }
 0x15d   :  { %v320_v57 = vrot.slane %v319_v55, 4  ;;  %v281_v58 = vrot.slane %v280_v56, 4 }
 0x15f   :  { %v321_v59 = vadd.f32 %v320_v57, %v319_v55  ;;  %v282_v60 = vadd.f32 %v281_v58, %v280_v56 }
 0x161   :  { %v322_v61 = vrot.slane %v321_v59, 2  ;;  %v283_v62 = vrot.slane %v282_v60, 2 }
 0x163   :  { %v323_v63 = vadd.f32 %v322_v61, %v321_v59  ;;  %v284_v0 = vadd.f32 %v283_v62, %v282_v60 }
 0x165   :  { %v324_v1 = vrot.slane %v323_v63, 1  ;;  %v285_v2 = vrot.slane %v284_v0, 1 }
 0x167   :  { %v325_v3 = vadd.f32 %v324_v1, %v323_v63  ;;  %v286_v4 = vadd.f32 %v285_v2, %v284_v0 }
 0x169   :  { %332 = vrot.lane.b32.xlu1 %v325_v3, %s732_s5  ;;  %v287_v5 = vmul.f32 0.125, %v286_v4 }
 0x16b   :  { %v288_v6 = vsub.f32 %v276_v53, %v287_v5 }
 0x16d   :  { %v289_v7 = vmul.f32 %v288_v6, %v288_v6 }
 0x16f   :  { %v290_v8 = vsel %vm279_vm9, %v289_v7, 0.0 }
 0x170   :  { %v291_v9 = vrot.slane %v290_v8, 4 }
 0x172   :  { %v292_v10 = vadd.f32 %v291_v9, %v290_v8 }
 0x174   :  { %v293_v11 = vrot.slane %v292_v10, 2 }
 0x176   :  { %v294_v12 = vadd.f32 %v293_v11, %v292_v10 }
 0x178   :  { %v295_v13 = vrot.slane %v294_v12, 1 }
 0x17a   :  { %v296_v14 = vadd.f32 %v295_v13, %v294_v12 }
 0x17c   :  { %v297_v15 = vmul.f32 0.125, %v296_v14 }
 0x17e   :  { %v298_v16 = vadd.f32 1e-05, %v297_v15 }
 0x180   :  { %654 = vrsqrt.f32 %v298_v16 }
 0x18d   :  { %v655_v17 = vpop.eup %654 }
 0x18e   :  { %v300_v19 = vmul.f32 %v655_v17, %v288_v6 }
 0x190   :  { %v308_v21 = vmul.f32 %v572_v18, %v300_v19 }
 0x192   :  { %v316_v22 = vadd.f32 %v573_v20, %v308_v21 }
 0x194   :  { %317 = vst.msk [vmem:[#allocation5] sm:$0xff] %vm279_vm9, %v316_v22 }
 0x1db   :  { %v333_v23 = vpop.permute.xlu1 %332 }
 0x1dc   :  { %621 = vmatmul.mubr.msk.f32.vlgmr.msra.gmra.mxu0 %vm334_vm10, %v333_v23 }
 0x29c   :  { %v403_v26 = vpop.f32.mrf.mxu0 }
 0x29d   :  { %v410_v27 = vrot.slane %v403_v26, %v409_v25 }
 0x29e   :  { %v622_v28 = vpop.f32.mrf.mxu0 }
 0x29f   :  { %412 = vrot.lane.b32.xlu1 %v410_v27, %s733_s7 }
 0x311   :  { %v413_v29 = vpop.permute.xlu1 %412 }
 0x312   :  { %v415_v30 = vsub.f32 %v276_v53, %v413_v29 }
 0x314   :  { %v416_v31 = vmul.f32 %v415_v30, %v415_v30 }
 0x316   :  { %v417_v32 = vsel %vm318_vm8, %v416_v31, 0.0 }
 0x317   :  { %v418_v33 = vrot.slane %v417_v32, 4 }
 0x319   :  { %v419_v34 = vadd.f32 %v418_v33, %v417_v32 }
 0x31b   :  { %v420_v36 = vrot.slane %v419_v34, 2 }
 0x31d   :  { %v421_v37 = vadd.f32 %v420_v36, %v419_v34 }
 0x31f   :  { %v422_v38 = vrot.slane %v421_v37, 1 }
 0x321   :  { %v423_v39 = vadd.f32 %v422_v38, %v421_v37 }
 0x323   :  { %425 = vrot.lane.b32.xlu0 %v423_v39, %s732_s5 }
 0x327   :  { %515 = vrot.lane.b32.xlu0 %v576_v40, %s733_s7 }
 0x395   :  { %v426_v35 = vpop.permute.xlu0 %425 }
 0x396   :  { %634 = vmatmul.mubr.msk.f32.vlgmr.msra.gmra.mxu1 %vm334_vm10, %v426_v35 }
 0x456   :  { %v495_v41 = vpop.f32.mrf.mxu1 }
 0x457   :  { %v496_v42 = vadd.f32 1e-05, %v495_v41 }
 0x458   :  { %v635_v43 = vpop.f32.mrf.mxu1 }
 0x459   :  { %656 = vrsqrt.f32 %v496_v42 }
 0x466   :  { %v657_v44 = vpop.eup %656 }
 0x467   :  { %v503_v45 = vrot.slane %v657_v44, %v409_v25 }
 0x469   :  { %505 = vrot.lane.b32.xlu1 %v503_v45, %s733_s7 }
 0x46d   :  { %525 = vrot.lane.b32.xlu1 %v577_v46, %s733_s7 }
 0x46e   :  { %689 = shalt.err (!%p686_p9)
}
 0x46f   :  { %543 = dma.vmem_to_hbm [thread:$0]  %s541_s28, 128, %s898_s11, [#allocation4]   ;;  %v516_v48 = vpop.permute.xlu0 %515 }
 0x470   :  { %s735_s10 = smov [#allocation6]  }
 0x471   :  { %s550_s13 = sshll.u32 %s735_s10, 4  ;;  %s551_s13 = int_to_ptr.vmem [resolvable:$true] %s550_s13 }
 0x472   :  { %s698_s4 = scalar_lea.vmem %s551_s13, 128  ;;  %p703_p11 = scmp.lt.s32.totalorder %s551_s13, %s551_s13 }
 0x473   :  { %p699_p10 = scmp.ne.s32.totalorder %s551_s13, %s698_s4  ;;  %p704_p12 = scmp.lt.s32.totalorder %s698_s4, %s698_s4 }
 0x475   :  { %p705_p13 = por %p704_p12, %p703_p11 }
 0x477   :  { %p706_p0 = pnand %p705_p13, %p699_p10 }
 0x4db   :  { %v506_v47 = vpop.permute.xlu1 %505 }
 0x4dc   :  { %v508_v49 = vmul.f32 %v506_v47, %v415_v30 }
 0x4de   :  { %v518_v50 = vmul.f32 %v516_v48, %v508_v49 }
 0x4df   :  { %v526_v51 = vpop.permute.xlu1 %525 }
 0x4e0   :  { %v528_v52 = vadd.f32 %v526_v51, %v518_v50 }
 0x4e2   :  { %530 = vrot.lane.b32.xlu0 %v528_v52, %s732_s5 }
 0x554   :  { %v531_v53 = vpop.permute.xlu0 %530 }
 0x555   :  { %533 = vst.msk [vmem:[#allocation6] sm:$0xff] %vm334_vm10, %v531_v53 }
 0x556   :  { %709 = shalt.err (!%p706_p0)
}
 0x557   :  { %553 = dma.vmem_to_hbm [thread:$0]  %s551_s13, 128, %s899_s12, [#allocation7]  }
 0x558   :  { %720 = dma.done.wait [#allocation4], 128  }
 0x559   :  { %721 = vsyncadd [#allocation4], 4294967168 }
 0x55a   :  { %722 = dma.done.wait [#allocation7], 128  }
 0x55b   :  { %723 = vsyncadd [#allocation7], 4294967168 }
 0x55c   :  { %560 = vsyncpa [#allocation3], 1 }
 0x55d   :  { %561 = vsyncpa [#allocation4], 1 }
 0x55e   :  { %562 = vsyncpa [#allocation7], 1 }

</bundles_post_ra>
